<compile_context>
chip_gen: v7x
topology: tpu7x:2x2x1
jax: 0.10.0
libtpu: 0.0.40
codegen_flags: <defaults>
</compile_context>

<pallas_src>
import functools

import jax
import jax.numpy as jnp
from jax.experimental import pallas as pl
from jax.experimental.pallas import tpu as pltpu


# ----------------------------------------------------------------------------
# Fused VAE forward kernel (one batch tile per grid step)
# ----------------------------------------------------------------------------
def _vae_kernel(
    x_ref,        # (TB, D_in)        f32  flattened input tile
    eps_ref,      # (TB, D_lat)       f32  standard-normal noise
    w1_ref,       # (D_in, H_enc)     bf16 encoder layer-1 weight
    b1_ref,       # (1, H_enc)        f32
    wml_ref,      # (H_enc, 2*D_lat)  bf16 fused [mu | logvar] head weight
    bml_ref,      # (1, 2*D_lat)      f32
    wd1_ref,      # (D_lat, H_dec)    bf16 decoder layer-1 weight
    bd1_ref,      # (1, H_dec)        f32
    wd2_ref,      # (H_dec, D_in)     bf16 decoder output weight
    bd2_ref,      # (1, D_in)         f32
    recs_ref,     # (TB, D_in)        out: reconstruction (flattened)
    mlz_ref,      # (TB, 3*D_lat)     out: packed [mu | logvar | z]
    *,
    d_lat: int,
    decode_from_z: bool,
):
    x = x_ref[...]                                    # f32

    # ---------------- encoder: h = relu(x @ W1 + b1) ----------------
    # bf16 MXU inputs, f32 accumulation, f32 elementwise.
    h = jnp.dot(x.astype(jnp.bfloat16), w1_ref[...],
                preferred_element_type=jnp.float32) + b1_ref[...]
    h = jnp.maximum(h, 0.0)

    # ---------------- fused [mu | logvar] head (single matmul) -------
    ml = jnp.dot(h.astype(jnp.bfloat16), wml_ref[...],
                 preferred_element_type=jnp.float32) + bml_ref[...]
    mu = ml[:, :d_lat]
    lv = ml[:, d_lat:]

    # ---------------- reparameterization sample ----------------------
    # z = randn_like(mu) * exp(0.5 * logvar) + mu
    z = eps_ref[...] * jnp.exp(0.5 * lv) + mu

    # ---------------- decoder ----------------------------------------
    # eval mode & forward_sample=False -> decode from mu (PyTorch else-branch)
    dec_in = z if decode_from_z else mu
    hd = jnp.dot(dec_in.astype(jnp.bfloat16), wd1_ref[...],
                 preferred_element_type=jnp.float32) + bd1_ref[...]
    hd = jnp.maximum(hd, 0.0)
    recs = jnp.dot(hd.astype(jnp.bfloat16), wd2_ref[...],
                   preferred_element_type=jnp.float32) + bd2_ref[...]

    # ---------------- stores ------------------------------------------
    recs_ref[...] = recs
    # Single lane-dense store for the three small outputs: [mu | logvar | z].
    mlz_ref[...] = jnp.concatenate([ml, z], axis=-1)


# ----------------------------------------------------------------------------
# Wrapper
# ----------------------------------------------------------------------------
def vae_forward(x_nchw, eps, packed, *, forward_sample=False, training=False):
    """Full VAE forward in one fused Pallas call.

    x_nchw : (B, C, H, W) f32
    eps    : (B, D_lat)   f32 standard-normal noise (randn_like equivalent)
    packed : dict from pack_params() (bf16 weights, fused mu/logvar head)
    returns: recs (B,C,H,W), mu (B,D_lat), logvar (B,D_lat), z (B,D_lat)
    """
    B, C, H, W = x_nchw.shape
    d_in = C * H * W
    d_lat = eps.shape[1]
    h_enc = packed["w1"].shape[1]
    h_dec = packed["wd1"].shape[1]
    decode_from_z = bool(forward_sample or training)

    x_flat = x_nchw.reshape(B, d_in)

    # Batch tiling: pad to a sublane multiple; tile with a parallel grid axis.
    tb = 128 if B > 128 else max(8, ((B + 7) // 8) * 8)
    b_pad = pl.cdiv(B, tb) * tb
    if b_pad != B:
        x_flat = jnp.pad(x_flat, ((0, b_pad - B), (0, 0)))
        eps = jnp.pad(eps, ((0, b_pad - B), (0, 0)))
    grid = (b_pad // tb,)

    batch_spec = lambda feat: pl.BlockSpec((tb, feat), lambda i: (i, 0))
    full_spec = lambda a: pl.BlockSpec(a.shape, lambda i: (0, 0))

    in_arrays = (
        x_flat, eps,
        packed["w1"], packed["b1"],
        packed["wml"], packed["bml"],
        packed["wd1"], packed["bd1"],
        packed["wd2"], packed["bd2"],
    )
    in_specs = [batch_spec(d_in), batch_spec(d_lat)] + [
        full_spec(a) for a in in_arrays[2:]
    ]

    out_shapes = (
        jax.ShapeDtypeStruct((b_pad, d_in), jnp.float32),       # recs (flat)
        jax.ShapeDtypeStruct((b_pad, 3 * d_lat), jnp.float32),  # [mu|lv|z]
    )
    out_specs = [batch_spec(d_in), batch_spec(3 * d_lat)]

    flops = 2 * b_pad * (d_in * h_enc + h_enc * (2 * d_lat)
                         + d_lat * h_dec + h_dec * d_in)
    bytes_accessed = sum(int(a.size) * a.dtype.itemsize for a in in_arrays)
    bytes_accessed += b_pad * d_in * 4 + b_pad * 3 * d_lat * 4
    cost = pl.CostEstimate(flops=flops,
                           transcendentals=b_pad * d_lat,
                           bytes_accessed=bytes_accessed)

    recs_flat, mlz = pl.pallas_call(
        functools.partial(_vae_kernel, d_lat=d_lat, decode_from_z=decode_from_z),
        out_shape=out_shapes,
        grid_spec=pltpu.PrefetchScalarGridSpec(
            num_scalar_prefetch=0,
            grid=grid,
            in_specs=in_specs,
            out_specs=out_specs,
        ),
        compiler_params=pltpu.CompilerParams(
            dimension_semantics=("parallel",),
        ),
        cost_estimate=cost,
    )(*in_arrays)

    recs = recs_flat[:B].reshape(B, C, H, W)
    mu = mlz[:B, :d_lat]
    lv = mlz[:B, d_lat:2 * d_lat]
    z = mlz[:B, 2 * d_lat:]
    return recs, mu, lv, z


# ----------------------------------------------------------------------------
# Parameter init (synthetic, deterministic) + one-time packing to bf16
# ----------------------------------------------------------------------------
def init_params(key, d_in, h_enc, d_lat, h_dec):
    ks = jax.random.split(key, 10)
    s = 0.05
    return {
        "w1":  s * jax.random.normal(ks[0], (d_in, h_enc), jnp.float32),
        "b1":  s * jax.random.normal(ks[1], (1, h_enc), jnp.float32),
        "wmu": s * jax.random.normal(ks[2], (h_enc, d_lat), jnp.float32),
        "bmu": s * jax.random.normal(ks[3], (1, d_lat), jnp.float32),
        "wlv": s * jax.random.normal(ks[4], (h_enc, d_lat), jnp.float32),
        "blv": s * jax.random.normal(ks[5], (1, d_lat), jnp.float32),
        "wd1": s * jax.random.normal(ks[6], (d_lat, h_dec), jnp.float32),
        "bd1": s * jax.random.normal(ks[7], (1, h_dec), jnp.float32),
        "wd2": s * jax.random.normal(ks[8], (h_dec, d_in), jnp.float32),
        "bd2": s * jax.random.normal(ks[9], (1, d_in), jnp.float32),
    }


def pack_params(p):
    """Fuse mu/logvar head weights and cast matmul weights to bf16 (once)."""
    return {
        "w1":  p["w1"].astype(jnp.bfloat16),
        "b1":  p["b1"],
        "wml": jnp.concatenate([p["wmu"], p["wlv"]], axis=1).astype(jnp.bfloat16),
        "bml": jnp.concatenate([p["bmu"], p["blv"]], axis=1),
        "wd1": p["wd1"].astype(jnp.bfloat16),
        "bd1": p["bd1"],
        "wd2": p["wd2"].astype(jnp.bfloat16),
        "bd2": p["bd2"],
    }


# ----------------------------------------------------------------------------
# Pure-JAX reference (same math: bf16 MXU inputs, f32 accumulation/elementwise)
# ----------------------------------------------------------------------------
def vae_forward_ref(x_nchw, eps, packed, *, forward_sample=False, training=False):
    B, C, H, W = x_nchw.shape
    d_lat = eps.shape[1]
    x = x_nchw.reshape(B, -1)
    dot = lambda a, w: jnp.dot(a.astype(jnp.bfloat16), w,
                               preferred_element_type=jnp.float32)
    h = jnp.maximum(dot(x, packed["w1"]) + packed["b1"], 0.0)
    ml = dot(h, packed["wml"]) + packed["bml"]
    mu, lv = ml[:, :d_lat], ml[:, d_lat:]
    z = eps * jnp.exp(0.5 * lv) + mu
    dec_in = z if (forward_sample or training) else mu
    hd = jnp.maximum(dot(dec_in, packed["wd1"]) + packed["bd1"], 0.0)
    recs = (dot(hd, packed["wd2"]) + packed["bd2"]).reshape(B, C, H, W)
    return recs, mu, lv, z


if __name__ == "__main__":
    # Small shapes consistent with the module's forward (NCHW image input).
    B, C, H, W = 2, 4, 16, 16
    D_IN = C * H * W          # 1024
    H_ENC = 64
    D_LAT = 16
    H_DEC = 64

    key = jax.random.PRNGKey(0)
    kx, keps, kp = jax.random.split(key, 3)

    x = jax.random.normal(kx, (B, C, H, W), jnp.float32)
    # torch.randn_like(latent_mu) equivalent: standard-normal noise, fixed seed.
    eps = jax.random.normal(keps, (B, D_LAT), jnp.float32)
    params = init_params(kp, D_IN, H_ENC, D_LAT, H_DEC)
    packed = pack_params(params)

    recs, mu, lv, z = vae_forward(x, eps, packed, forward_sample=False,
                                  training=False)
    jax.block_until_ready((recs, mu, lv, z))

    # Cross-check against the pure-JAX reference (same bf16/f32 math).
    r_recs, r_mu, r_lv, r_z = vae_forward_ref(
        x, eps, packed, forward_sample=False, training=False
    )
    assert jnp.allclose(recs, r_recs, atol=2e-3, rtol=2e-3)
    assert jnp.allclose(mu, r_mu, atol=2e-3, rtol=2e-3)
    assert jnp.allclose(lv, r_lv, atol=2e-3, rtol=2e-3)
    assert jnp.allclose(z, r_z, atol=2e-3, rtol=2e-3)

    print("KERNEL_OK")
</pallas_src>

<mosaic_0001>
module attributes {stable_mosaic.version = 11 : i64} {
  func.func @_vae_kernel(%arg0: i32, %arg1: memref<8x1024xf32, #tpu.memory_space<vmem>>, %arg2: memref<8x16xf32, #tpu.memory_space<vmem>>, %arg3: memref<1024x64xbf16, #tpu.memory_space<vmem>>, %arg4: memref<1x64xf32, #tpu.memory_space<vmem>>, %arg5: memref<64x32xbf16, #tpu.memory_space<vmem>>, %arg6: memref<1x32xf32, #tpu.memory_space<vmem>>, %arg7: memref<16x64xbf16, #tpu.memory_space<vmem>>, %arg8: memref<1x64xf32, #tpu.memory_space<vmem>>, %arg9: memref<64x1024xbf16, #tpu.memory_space<vmem>>, %arg10: memref<1x1024xf32, #tpu.memory_space<vmem>>, %arg11: memref<8x1024xf32, #tpu.memory_space<vmem>>, %arg12: memref<8x48xf32, #tpu.memory_space<vmem>>) attributes {dimension_semantics = [#tpu.dimension_semantics<parallel>], iteration_bounds = array<i64: 1>, scalar_prefetch = 0 : i64, scratch_operands = 0 : i64, tpu.core_type = #tpu.core_type<tc>, window_params = [{transform_indices = @transform_0, window_bounds = array<i64: 8, 1024>}, {transform_indices = @transform_1, window_bounds = array<i64: 8, 16>}, {pipeline_mode = #tpu.pipeline_mode<synchronous>, transform_indices = @transform_2, window_bounds = array<i64: 1024, 64>}, {pipeline_mode = #tpu.pipeline_mode<synchronous>, transform_indices = @transform_3, window_bounds = array<i64: 1, 64>}, {pipeline_mode = #tpu.pipeline_mode<synchronous>, transform_indices = @transform_4, window_bounds = array<i64: 64, 32>}, {pipeline_mode = #tpu.pipeline_mode<synchronous>, transform_indices = @transform_5, window_bounds = array<i64: 1, 32>}, {pipeline_mode = #tpu.pipeline_mode<synchronous>, transform_indices = @transform_6, window_bounds = array<i64: 16, 64>}, {pipeline_mode = #tpu.pipeline_mode<synchronous>, transform_indices = @transform_7, window_bounds = array<i64: 1, 64>}, {pipeline_mode = #tpu.pipeline_mode<synchronous>, transform_indices = @transform_8, window_bounds = array<i64: 64, 1024>}, {pipeline_mode = #tpu.pipeline_mode<synchronous>, transform_indices = @transform_9, window_bounds = array<i64: 1, 1024>}, {transform_indices = @transform_10, window_bounds = array<i64: 8, 1024>}, {transform_indices = @transform_11, window_bounds = array<i64: 8, 48>}]} {
    %c0 = arith.constant 0 : index
    %c0_0 = arith.constant 0 : index
    %0 = vector.load %arg1[%c0, %c0_0] : memref<8x1024xf32, #tpu.memory_space<vmem>>, vector<8x1024xf32>
    %1 = arith.truncf %0 : vector<8x1024xf32> to vector<8x1024xbf16>
    %c0_1 = arith.constant 0 : index
    %c0_2 = arith.constant 0 : index
    %2 = vector.load %arg3[%c0_1, %c0_2] : memref<1024x64xbf16, #tpu.memory_space<vmem>>, vector<1024x64xbf16>
    %cst = arith.constant dense<0.000000e+00> : vector<8x64xf32>
    %3 = tpu.matmul %1, %2, %cst {dimension_numbers = #tpu.dot_dimension_numbers<[1], [0], [0], [1], [0, 0, 1, 1], [], []>} : vector<8x1024xbf16>, vector<1024x64xbf16>, vector<8x64xf32> -> vector<8x64xf32>
    %c0_3 = arith.constant 0 : index
    %c0_4 = arith.constant 0 : index
    %4 = vector.load %arg4[%c0_3, %c0_4] : memref<1x64xf32, #tpu.memory_space<vmem>>, vector<1x64xf32>
    %5 = vector.broadcast %4 : vector<1x64xf32> to vector<8x64xf32>
    %6 = arith.addf %3, %5 : vector<8x64xf32>
    %cst_5 = arith.constant 0.000000e+00 : f32
    %7 = vector.broadcast %cst_5 : f32 to vector<8x64xf32>
    %8 = arith.maximumf %6, %7 : vector<8x64xf32>
    %9 = arith.truncf %8 : vector<8x64xf32> to vector<8x64xbf16>
    %c0_6 = arith.constant 0 : index
    %c0_7 = arith.constant 0 : index
    %10 = vector.load %arg5[%c0_6, %c0_7] : memref<64x32xbf16, #tpu.memory_space<vmem>>, vector<64x32xbf16>
    %cst_8 = arith.constant dense<0.000000e+00> : vector<8x32xf32>
    %11 = tpu.matmul %9, %10, %cst_8 {dimension_numbers = #tpu.dot_dimension_numbers<[1], [0], [0], [1], [0, 0, 1, 1], [], []>} : vector<8x64xbf16>, vector<64x32xbf16>, vector<8x32xf32> -> vector<8x32xf32>
    %c0_9 = arith.constant 0 : index
    %c0_10 = arith.constant 0 : index
    %12 = vector.load %arg6[%c0_9, %c0_10] : memref<1x32xf32, #tpu.memory_space<vmem>>, vector<1x32xf32>
    %13 = vector.broadcast %12 : vector<1x32xf32> to vector<8x32xf32>
    %14 = arith.addf %11, %13 : vector<8x32xf32>
    %15 = vector.extract_strided_slice %14 {offsets = [0, 0], sizes = [8, 16], strides = [1, 1]} : vector<8x32xf32> to vector<8x16xf32>
    %16 = vector.extract_strided_slice %14 {offsets = [0, 16], sizes = [8, 16], strides = [1, 1]} : vector<8x32xf32> to vector<8x16xf32>
    %c0_11 = arith.constant 0 : index
    %c0_12 = arith.constant 0 : index
    %17 = vector.load %arg2[%c0_11, %c0_12] : memref<8x16xf32, #tpu.memory_space<vmem>>, vector<8x16xf32>
    %cst_13 = arith.constant 5.000000e-01 : f32
    %18 = vector.broadcast %cst_13 : f32 to vector<8x16xf32>
    %19 = arith.mulf %18, %16 : vector<8x16xf32>
    %20 = math.exp %19 : vector<8x16xf32>
    %21 = arith.mulf %17, %20 : vector<8x16xf32>
    %22 = arith.addf %21, %15 : vector<8x16xf32>
    %23 = arith.truncf %15 : vector<8x16xf32> to vector<8x16xbf16>
    %c0_14 = arith.constant 0 : index
    %c0_15 = arith.constant 0 : index
    %24 = vector.load %arg7[%c0_14, %c0_15] : memref<16x64xbf16, #tpu.memory_space<vmem>>, vector<16x64xbf16>
    %cst_16 = arith.constant dense<0.000000e+00> : vector<8x64xf32>
    %25 = tpu.matmul %23, %24, %cst_16 {dimension_numbers = #tpu.dot_dimension_numbers<[1], [0], [0], [1], [0, 0, 1, 1], [], []>} : vector<8x16xbf16>, vector<16x64xbf16>, vector<8x64xf32> -> vector<8x64xf32>
    %c0_17 = arith.constant 0 : index
    %c0_18 = arith.constant 0 : index
    %26 = vector.load %arg8[%c0_17, %c0_18] : memref<1x64xf32, #tpu.memory_space<vmem>>, vector<1x64xf32>
    %27 = vector.broadcast %26 : vector<1x64xf32> to vector<8x64xf32>
    %28 = arith.addf %25, %27 : vector<8x64xf32>
    %cst_19 = arith.constant 0.000000e+00 : f32
    %29 = vector.broadcast %cst_19 : f32 to vector<8x64xf32>
    %30 = arith.maximumf %28, %29 : vector<8x64xf32>
    %31 = arith.truncf %30 : vector<8x64xf32> to vector<8x64xbf16>
    %c0_20 = arith.constant 0 : index
    %c0_21 = arith.constant 0 : index
    %32 = vector.load %arg9[%c0_20, %c0_21] : memref<64x1024xbf16, #tpu.memory_space<vmem>>, vector<64x1024xbf16>
    %cst_22 = arith.constant dense<0.000000e+00> : vector<8x1024xf32>
    %33 = tpu.matmul %31, %32, %cst_22 {dimension_numbers = #tpu.dot_dimension_numbers<[1], [0], [0], [1], [0, 0, 1, 1], [], []>} : vector<8x64xbf16>, vector<64x1024xbf16>, vector<8x1024xf32> -> vector<8x1024xf32>
    %c0_23 = arith.constant 0 : index
    %c0_24 = arith.constant 0 : index
    %34 = vector.load %arg10[%c0_23, %c0_24] : memref<1x1024xf32, #tpu.memory_space<vmem>>, vector<1x1024xf32>
    %35 = vector.broadcast %34 : vector<1x1024xf32> to vector<8x1024xf32>
    %36 = arith.addf %33, %35 : vector<8x1024xf32>
    %c0_25 = arith.constant 0 : index
    %c0_26 = arith.constant 0 : index
    %37 = vector.load %arg11[%c0_25, %c0_26] : memref<8x1024xf32, #tpu.memory_space<vmem>>, vector<8x1024xf32>
    tpu.vector_store %arg11[%c0_25, %c0_26], %36 {strides = array<i32>} : memref<8x1024xf32, #tpu.memory_space<vmem>>, vector<8x1024xf32>,
    %38 = tpu.concatenate %14, %22 in 1 : vector<8x32xf32>, vector<8x16xf32> -> vector<8x48xf32>
    %c0_27 = arith.constant 0 : index
    %c0_28 = arith.constant 0 : index
    %39 = vector.load %arg12[%c0_27, %c0_28] : memref<8x48xf32, #tpu.memory_space<vmem>>, vector<8x48xf32>
    tpu.vector_store %arg12[%c0_27, %c0_28], %38 {strides = array<i32>} : memref<8x48xf32, #tpu.memory_space<vmem>>, vector<8x48xf32>,
    return
  }
  func.func @transform_0(%arg0: i32) -> (i32, i32) {
    %c0_i32 = arith.constant 0 : i32
    %c0_i32_0 = arith.constant 0 : i32
    return %arg0, %c0_i32 : i32, i32
  }
  func.func @transform_1(%arg0: i32) -> (i32, i32) {
    %c0_i32 = arith.constant 0 : i32
    %c0_i32_0 = arith.constant 0 : i32
    return %arg0, %c0_i32 : i32, i32
  }
  func.func @transform_2(%arg0: i32) -> (i32, i32) {
    %c0_i32 = arith.constant 0 : i32
    %c0_i32_0 = arith.constant 0 : i32
    %c0_i32_1 = arith.constant 0 : i32
    return %c0_i32, %c0_i32_0 : i32, i32
  }
  func.func @transform_3(%arg0: i32) -> (i32, i32) {
    %c0_i32 = arith.constant 0 : i32
    %c0_i32_0 = arith.constant 0 : i32
    %c0_i32_1 = arith.constant 0 : i32
    return %c0_i32, %c0_i32_0 : i32, i32
  }
  func.func @transform_4(%arg0: i32) -> (i32, i32) {
    %c0_i32 = arith.constant 0 : i32
    %c0_i32_0 = arith.constant 0 : i32
    %c0_i32_1 = arith.constant 0 : i32
    return %c0_i32, %c0_i32_0 : i32, i32
  }
  func.func @transform_5(%arg0: i32) -> (i32, i32) {
    %c0_i32 = arith.constant 0 : i32
    %c0_i32_0 = arith.constant 0 : i32
    %c0_i32_1 = arith.constant 0 : i32
    return %c0_i32, %c0_i32_0 : i32, i32
  }
  func.func @transform_6(%arg0: i32) -> (i32, i32) {
    %c0_i32 = arith.constant 0 : i32
    %c0_i32_0 = arith.constant 0 : i32
    %c0_i32_1 = arith.constant 0 : i32
    return %c0_i32, %c0_i32_0 : i32, i32
  }
  func.func @transform_7(%arg0: i32) -> (i32, i32) {
    %c0_i32 = arith.constant 0 : i32
    %c0_i32_0 = arith.constant 0 : i32
    %c0_i32_1 = arith.constant 0 : i32
    return %c0_i32, %c0_i32_0 : i32, i32
  }
  func.func @transform_8(%arg0: i32) -> (i32, i32) {
    %c0_i32 = arith.constant 0 : i32
    %c0_i32_0 = arith.constant 0 : i32
    %c0_i32_1 = arith.constant 0 : i32
    return %c0_i32, %c0_i32_0 : i32, i32
  }
  func.func @transform_9(%arg0: i32) -> (i32, i32) {
    %c0_i32 = arith.constant 0 : i32
    %c0_i32_0 = arith.constant 0 : i32
    %c0_i32_1 = arith.constant 0 : i32
    return %c0_i32, %c0_i32_0 : i32, i32
  }
  func.func @transform_10(%arg0: i32) -> (i32, i32) {
    %c0_i32 = arith.constant 0 : i32
    %c0_i32_0 = arith.constant 0 : i32
    return %arg0, %c0_i32 : i32, i32
  }
  func.func @transform_11(%arg0: i32) -> (i32, i32) {
    %c0_i32 = arith.constant 0 : i32
    %c0_i32_0 = arith.constant 0 : i32
    return %arg0, %c0_i32 : i32, i32
  }
}

</mosaic_0001>

<bundles_post_ra>
// kernel: tpu_custom_call.1
= control target key start
LH: loop header
LB: loop body
LE: loop exit
PB: predicated region body
PF: predicated region fallthrough
CT: control target
= control target key end

     0   :  { %17 = vsyncpa [#allocation3], 0  ;;  %s2131_s0 = inlined_call_operand.vmem [shape: f32[8,1024], index: 0, kind: input, shape index: {}]   ;;  %s2132_s1 = inlined_call_operand.vmem [shape: f32[8,16], index: 1, kind: input, shape index: {}]   ;;  %s2133_s2 = inlined_call_operand.vmem [shape: bf16[1024,64], index: 2, kind: input, shape index: {}]   ;;  %s2134_s3 = inlined_call_operand.vmem [shape: f32[1,64], index: 3, kind: input, shape index: {}]   ;;  %s2135_s4 = inlined_call_operand.vmem [shape: bf16[64,32], index: 4, kind: input, shape index: {}]   ;;  %s2136_s5 = inlined_call_operand.vmem [shape: f32[1,32], index: 5, kind: input, shape index: {}]   ;;  %s2137_s6 = inlined_call_operand.vmem [shape: bf16[16,64], index: 6, kind: input, shape index: {}]   ;;  %s2138_s7 = inlined_call_operand.vmem [shape: f32[1,64], index: 7, kind: input, shape index: {}]   ;;  %s2139_s8 = inlined_call_operand.vmem [shape: bf16[64,1024], index: 8, kind: input, shape index: {}]   ;;  %s2140_s9 = inlined_call_operand.vmem [shape: f32[1,1024], index: 9, kind: input, shape index: {}]   ;;  %s2141_s10 = inlined_call_operand.hbm [shape: f32[8,1024], index: 10, kind: output, shape index: {0}]   ;;  %s2142_s11 = inlined_call_operand.hbm [shape: f32[8,48], index: 11, kind: output, shape index: {1}]  }
   0x1   :  { %v1567_v0 = vld [vmem:[%s2133_s2 + $0x40] sm:$0xff]   ;;  %v1571_v4 = vld [vmem:[%s2133_s2 + $0x48] sm:$0xff]   ;;  %v1575_v8 = vld [vmem:[%s2133_s2 + $0x50] sm:$0xff]  }
   0x2   :  { %v1568_v1 = vld [vmem:[%s2133_s2 + $0xc0] sm:$0xff]   ;;  %1447 = vmatprep.subr.bf16.mxu0 %v1567_v0  ;;  %v1572_v5 = vld [vmem:[%s2133_s2 + $0xc8] sm:$0xff]   ;;  %v1576_v9 = vld [vmem:[%s2133_s2 + $0xd0] sm:$0xff]  }
   0x3   :  { %v1569_v2 = vld [vmem:[%s2133_s2] sm:$0xff]   ;;  %1469 = vmatprep.subr.bf16.mxu1 %v1568_v1  ;;  %v1573_v6 = vld [vmem:[%s2133_s2 + $0x8] sm:$0xff]   ;;  %v1577_v10 = vld [vmem:[%s2133_s2 + $0x10] sm:$0xff]  }
   0x4   :  { %v1570_v3 = vld [vmem:[%s2133_s2 + $0x80] sm:$0xff]   ;;  %1448 = vmatpush3.bf16.msra.mxu0 %v1569_v2  ;;  %v1574_v7 = vld [vmem:[%s2133_s2 + $0x88] sm:$0xff]   ;;  %v1578_v11 = vld [vmem:[%s2133_s2 + $0x90] sm:$0xff]  }
   0x5   :  { %1470 = vmatpush3.bf16.msra.mxu1 %v1570_v3  ;;  %1449 = vmatprep.subr.bf16.mxu0 %v1571_v4  ;;  %v1579_v12 = vld [vmem:[%s2133_s2 + $0x58] sm:$0xff]   ;;  %v1583_v16 = vld [vmem:[%s2133_s2 + $0x60] sm:$0xff]   ;;  %v1587_v20 = vld [vmem:[%s2133_s2 + $0x68] sm:$0xff]  }
   0x6   :  { %1471 = vmatprep.subr.bf16.mxu1 %v1572_v5  ;;  %v1580_v13 = vld [vmem:[%s2133_s2 + $0xd8] sm:$0xff]   ;;  %v1584_v17 = vld [vmem:[%s2133_s2 + $0xe0] sm:$0xff]   ;;  %v1588_v21 = vld [vmem:[%s2133_s2 + $0xe8] sm:$0xff]  }
   0x7   :  { %v1581_v14 = vld [vmem:[%s2133_s2 + $0x18] sm:$0xff]   ;;  %v1585_v18 = vld [vmem:[%s2133_s2 + $0x20] sm:$0xff]   ;;  %v1589_v22 = vld [vmem:[%s2133_s2 + $0x28] sm:$0xff]  }
   0x8   :  { %1450 = vmatpush3.bf16.msra.mxu0 %v1573_v6  ;;  %v1582_v15 = vld [vmem:[%s2133_s2 + $0x98] sm:$0xff]   ;;  %v1586_v19 = vld [vmem:[%s2133_s2 + $0xa0] sm:$0xff]   ;;  %v1590_v23 = vld [vmem:[%s2133_s2 + $0xa8] sm:$0xff]  }
   0x9   :  { %1472 = vmatpush3.bf16.msra.mxu1 %v1574_v7  ;;  %1451 = vmatprep.subr.bf16.mxu0 %v1575_v8  ;;  %v1591_v24 = vld [vmem:[%s2133_s2 + $0x70] sm:$0xff]   ;;  %v1595_v28 = vld [vmem:[%s2133_s2 + $0x78] sm:$0xff]   ;;  %v41_v32 = vld [vmem:[%s2131_s0 + $0x8] sm:$0xff] }
   0xa   :  { %1473 = vmatprep.subr.bf16.mxu1 %v1576_v9  ;;  %v1592_v25 = vld [vmem:[%s2133_s2 + $0xf0] sm:$0xff]   ;;  %v1596_v29 = vld [vmem:[%s2133_s2 + $0xf8] sm:$0xff]   ;;  %v40_v34 = vld [vmem:[%s2131_s0] sm:$0xff]  ;;  %v49_v35 = vpack.c.bf16 %v41_v32, %v41_v32 }
   0xb   :  { %v1593_v26 = vld [vmem:[%s2133_s2 + $0x30] sm:$0xff]   ;;  %v1597_v30 = vld [vmem:[%s2133_s2 + $0x38] sm:$0xff]   ;;  %v48_v37 = vpack.c.bf16 %v40_v34, %v40_v34  ;;  %v1599_v40 = vld [vmem:[%s2133_s2 + $0x140] sm:$0xff]  }
   0xc   :  { %1452 = vmatpush3.bf16.msra.mxu0 %v1577_v10  ;;  %v1594_v27 = vld [vmem:[%s2133_s2 + $0xb0] sm:$0xff]   ;;  %v1598_v31 = vld [vmem:[%s2133_s2 + $0xb8] sm:$0xff]   ;;  %607 = vmatprep.mubr.bf16.mxu0 %v49_v35  ;;  %v1600_v41 = vld [vmem:[%s2133_s2 + $0x1c0] sm:$0xff]  }
   0xd   :  { %1474 = vmatpush3.bf16.msra.mxu1 %v1578_v11  ;;  %1453 = vmatprep.subr.bf16.mxu0 %v1579_v12  ;;  %v43_v33 = vld [vmem:[%s2131_s0 + $0x18] sm:$0xff]  ;;  %v42_v38 = vld [vmem:[%s2131_s0 + $0x10] sm:$0xff]  ;;  %v1601_v42 = vld [vmem:[%s2133_s2 + $0x100] sm:$0xff]  }
   0xe   :  { %1475 = vmatprep.subr.bf16.mxu1 %v1580_v13  ;;  %v51_v36 = vpack.c.bf16 %v43_v33, %v43_v33  ;;  %v50_v39 = vpack.c.bf16 %v42_v38, %v42_v38  ;;  %v1602_v43 = vld [vmem:[%s2133_s2 + $0x180] sm:$0xff]   ;;  %v1603_v44 = vld [vmem:[%s2133_s2 + $0x148] sm:$0xff]   ;;  %v1607_v48 = vld [vmem:[%s2133_s2 + $0x150] sm:$0xff]  }
   0xf   :  { %v1604_v45 = vld [vmem:[%s2133_s2 + $0x1c8] sm:$0xff]   ;;  %v1608_v49 = vld [vmem:[%s2133_s2 + $0x1d0] sm:$0xff]   ;;  %v1611_v52 = vld [vmem:[%s2133_s2 + $0x158] sm:$0xff]  }
  0x10   :  { %1454 = vmatpush3.bf16.msra.mxu0 %v1581_v14  ;;  %647 = vmatprep.mubr.bf16.mxu1 %v51_v36  ;;  %v1605_v46 = vld [vmem:[%s2133_s2 + $0x108] sm:$0xff]   ;;  %v1609_v50 = vld [vmem:[%s2133_s2 + $0x110] sm:$0xff]   ;;  %v1612_v53 = vld [vmem:[%s2133_s2 + $0x1d8] sm:$0xff]  }
  0x11   :  { %1476 = vmatpush3.bf16.msra.mxu1 %v1582_v15  ;;  %1455 = vmatprep.subr.bf16.mxu0 %v1583_v16  ;;  %v1606_v47 = vld [vmem:[%s2133_s2 + $0x188] sm:$0xff]   ;;  %v1610_v51 = vld [vmem:[%s2133_s2 + $0x190] sm:$0xff]   ;;  %v1613_v54 = vld [vmem:[%s2133_s2 + $0x118] sm:$0xff]  }
  0x12   :  { %1477 = vmatprep.subr.bf16.mxu1 %v1584_v17  ;;  %v1614_v55 = vld [vmem:[%s2133_s2 + $0x198] sm:$0xff]   ;;  %v1615_v56 = vld [vmem:[%s2133_s2 + $0x160] sm:$0xff]   ;;  %v1619_v60 = vld [vmem:[%s2133_s2 + $0x168] sm:$0xff]  }
  0x13   :  { %v1616_v57 = vld [vmem:[%s2133_s2 + $0x1e0] sm:$0xff]   ;;  %v1620_v61 = vld [vmem:[%s2133_s2 + $0x1e8] sm:$0xff]   ;;  %v1623_v0 = vld [vmem:[%s2133_s2 + $0x170] sm:$0xff]  }
  0x14   :  { %1456 = vmatpush3.bf16.msra.mxu0 %v1585_v18  ;;  %v1617_v58 = vld [vmem:[%s2133_s2 + $0x120] sm:$0xff]   ;;  %v1621_v62 = vld [vmem:[%s2133_s2 + $0x128] sm:$0xff]   ;;  %v1624_v1 = vld [vmem:[%s2133_s2 + $0x1f0] sm:$0xff]  }
  0x15   :  { %1478 = vmatpush3.bf16.msra.mxu1 %v1586_v19  ;;  %1457 = vmatprep.subr.bf16.mxu0 %v1587_v20  ;;  %v1618_v59 = vld [vmem:[%s2133_s2 + $0x1a0] sm:$0xff]   ;;  %v1622_v63 = vld [vmem:[%s2133_s2 + $0x1a8] sm:$0xff]   ;;  %v1625_v2 = vld [vmem:[%s2133_s2 + $0x130] sm:$0xff]  }
  0x16   :  { %1479 = vmatprep.subr.bf16.mxu1 %v1588_v21  ;;  %v1626_v3 = vld [vmem:[%s2133_s2 + $0x1b0] sm:$0xff]   ;;  %v1627_v4 = vld [vmem:[%s2133_s2 + $0x178] sm:$0xff]   ;;  %v45_v8 = vld [vmem:[%s2131_s0 + $0x28] sm:$0xff] }
  0x17   :  { %v1628_v5 = vld [vmem:[%s2133_s2 + $0x1f8] sm:$0xff]   ;;  %v53_v10 = vpack.c.bf16 %v45_v8, %v45_v8  ;;  %v44_v12 = vld [vmem:[%s2131_s0 + $0x20] sm:$0xff]  ;;  %v46_v13 = vld [vmem:[%s2131_s0 + $0x30] sm:$0xff] }
  0x18   :  { %1458 = vmatpush3.bf16.msra.mxu0 %v1589_v22  ;;  %v1629_v6 = vld [vmem:[%s2133_s2 + $0x138] sm:$0xff]   ;;  %v52_v14 = vpack.c.bf16 %v44_v12, %v44_v12  ;;  %v54_v15 = vpack.c.bf16 %v46_v13, %v46_v13 }
  0x19   :  { %1480 = vmatpush3.bf16.msra.mxu1 %v1590_v23  ;;  %1459 = vmatprep.subr.bf16.mxu0 %v1591_v24  ;;  %v1630_v7 = vld [vmem:[%s2133_s2 + $0x1b8] sm:$0xff]  }
  0x1a   :  { %1481 = vmatprep.subr.bf16.mxu1 %v1592_v25  ;;  %v47_v9 = vld [vmem:[%s2131_s0 + $0x38] sm:$0xff] }
  0x1b   :  { %v55_v11 = vpack.c.bf16 %v47_v9, %v47_v9 }
  0x1c   :  { %1460 = vmatpush3.bf16.msra.mxu0 %v1593_v26 }
  0x1d   :  { %1482 = vmatpush3.bf16.msra.mxu1 %v1594_v27  ;;  %1461 = vmatprep.subr.bf16.mxu0 %v1595_v28 }
  0x1e   :  { %1483 = vmatprep.subr.bf16.mxu1 %v1596_v29 }
  0x20   :  { %1462 = vmatpush3.bf16.msra.mxu0 %v1597_v30 }
  0x21   :  { %1484 = vmatpush3.bf16.msra.mxu1 %v1598_v31  ;;  %1491 = vmatprep.subr.bf16.mxu0 %v1599_v40 }
  0x22   :  { %1513 = vmatprep.subr.bf16.mxu1 %v1600_v41 }
  0x23   :  { %608 = vmatmul.mubr.bf16.vlgmr.msra.gmra.mrb[0].mxu0 %v48_v37 }
  0x24   :  { %648 = vmatmul.mubr.bf16.vlgmr.msra.gmra.mrb[0].mxu1 %v50_v39  ;;  %1492 = vmatpush3.bf16.msra.mxu0 %v1601_v42 }
  0x25   :  { %1514 = vmatpush3.bf16.msra.mxu1 %v1602_v43  ;;  %1493 = vmatprep.subr.bf16.mxu0 %v1603_v44 }
  0x26   :  { %1515 = vmatprep.subr.bf16.mxu1 %v1604_v45  ;;  %687 = vmatprep.mubr.bf16.mxu0 %v53_v10 }
  0x27   :  { %727 = vmatprep.mubr.bf16.mxu1 %v55_v11 }
  0x28   :  { %1494 = vmatpush3.bf16.msra.mxu0 %v1605_v46 }
  0x29   :  { %1516 = vmatpush3.bf16.msra.mxu1 %v1606_v47  ;;  %1495 = vmatprep.subr.bf16.mxu0 %v1607_v48 }
  0x2a   :  { %1517 = vmatprep.subr.bf16.mxu1 %v1608_v49 }
  0x2c   :  { %1496 = vmatpush3.bf16.msra.mxu0 %v1609_v50 }
  0x2d   :  { %1518 = vmatpush3.bf16.msra.mxu1 %v1610_v51  ;;  %1497 = vmatprep.subr.bf16.mxu0 %v1611_v52 }
  0x2e   :  { %1519 = vmatprep.subr.bf16.mxu1 %v1612_v53 }
  0x30   :  { %1498 = vmatpush3.bf16.msra.mxu0 %v1613_v54 }
  0x31   :  { %1520 = vmatpush3.bf16.msra.mxu1 %v1614_v55  ;;  %1499 = vmatprep.subr.bf16.mxu0 %v1615_v56 }
  0x32   :  { %1521 = vmatprep.subr.bf16.mxu1 %v1616_v57 }
  0x34   :  { %1500 = vmatpush3.bf16.msra.mxu0 %v1617_v58 }
  0x35   :  { %1522 = vmatpush3.bf16.msra.mxu1 %v1618_v59  ;;  %1501 = vmatprep.subr.bf16.mxu0 %v1619_v60 }
  0x36   :  { %1523 = vmatprep.subr.bf16.mxu1 %v1620_v61 }
  0x38   :  { %1502 = vmatpush3.bf16.msra.mxu0 %v1621_v62 }
  0x39   :  { %1524 = vmatpush3.bf16.msra.mxu1 %v1622_v63  ;;  %1503 = vmatprep.subr.bf16.mxu0 %v1623_v0 }
  0x3a   :  { %1525 = vmatprep.subr.bf16.mxu1 %v1624_v1 }
  0x3c   :  { %1504 = vmatpush3.bf16.msra.mxu0 %v1625_v2 }
  0x3d   :  { %1526 = vmatpush3.bf16.msra.mxu1 %v1626_v3  ;;  %1505 = vmatprep.subr.bf16.mxu0 %v1627_v4 }
  0x3e   :  { %1527 = vmatprep.subr.bf16.mxu1 %v1628_v5 }
  0x40   :  { %1506 = vmatpush3.bf16.msra.mxu0 %v1629_v6 }
  0x41   :  { %1528 = vmatpush3.bf16.msra.mxu1 %v1630_v7 }
  0x43   :  { %688 = vmatmul.mubr.bf16.vlgmr.msra.gmra.mrb[4].mxu0 %v52_v14 }
  0x44   :  { %728 = vmatmul.mubr.bf16.vlgmr.msra.gmra.mrb[4].mxu1 %v54_v15 }
  0x45   :  { %18 = vsyncpa [#allocation5], 0  ;;  %v1631_v16 = vld [vmem:[%s2135_s4] sm:$0xff]   ;;  %v1686_v17 = vmov 0.0   ;;  %v1632_v18 = vld [vmem:[%s2135_s4 + $0x8] sm:$0xff]   ;;  %vm1687_vm0 = vmmov 0  }
  0x46   :  { %1542 = vmatprep.subr.bf16.mxu0 %v1686_v17  ;;  %1554 = vmatprep.subr.bf16.mxu1 %v1686_v17  ;;  %v1633_v19 = vld [vmem:[%s2135_s4 + $0x10] sm:$0xff]   ;;  %v1634_v20 = vld [vmem:[%s2135_s4 + $0x18] sm:$0xff]   ;;  %v1635_v21 = vld [vmem:[%s2137_s6] sm:$0xff]   ;;  %vm776_vm1 = vcmask 523264   ;;  %vm846_vm2 = vcmask 130048   ;;  %s1688_s4 = smov 112  }
  0x47   :  { %1543 = vmatpush3.bf16.msra.mxu0 %v1631_v16  ;;  %1550 = vmatprep.mubr.msk.bf16.mxu0 %vm1687_vm0, %v1686_v17  ;;  %v1337_v24 = vld [vmem:[%s2134_s3] ss:$0 sm:$0xff]  ;;  %v893_v60 = vld [vmem:[%s2139_s8 + $0x8] sm:$0xff]  ;;  %s1690_s14 = smov 32   ;;  %vm1305_vm3 = vcmask 261120   ;;  %vm1307_vm4 = vcmask 392192  }
  0x48   :  { %1544 = vmatprep.subr.bf16.mxu0 %v1686_v17  ;;  %1556 = vmatprep.mubr.msk.bf16.mxu1 %vm1687_vm0, %v1686_v17  ;;  %v1402_v49 = vld [vmem:[%s2136_s5] ss:$0 sm:$0xff]  ;;  %v897_v63 = vld [vmem:[%s2139_s8 + $0x28] sm:$0xff] }
  0x49   :  { %1555 = vmatpush3.bf16.msra.mxu1 %v1635_v21  ;;  %v892_v58 = vld [vmem:[%s2139_s8] sm:$0xff]  ;;  %v1413_v2 = vcombine.low %v893_v60, %v897_v63  ;;  %v1414_v3 = vcombine.high %v893_v60, %v897_v63  ;;  %v901_v5 = vld [vmem:[%s2139_s8 + $0x48] sm:$0xff]  ;;  %v918_v63 = vld [vmem:[%s2139_s8 + $0xd0] sm:$0xff] }
  0x4a   :  { %v896_v59 = vld [vmem:[%s2139_s8 + $0x20] sm:$0xff]  ;;  %v905_v6 = vld [vmem:[%s2139_s8 + $0x68] sm:$0xff] }
  0x4b   :  { %1545 = vmatpush3.bf16.msra.mxu0 %v1632_v18  ;;  %v1411_v61 = vcombine.low %v892_v58, %v896_v59  ;;  %v1412_v62 = vcombine.high %v892_v58, %v896_v59  ;;  %v900_v0 = vld [vmem:[%s2139_s8 + $0x40] sm:$0xff]  ;;  %v1422_v8 = vcombine.high %v901_v5, %v905_v6  ;;  %v909_v10 = vld [vmem:[%s2139_s8 + $0x88] sm:$0xff]  ;;  %v1421_v13 = vcombine.low %v901_v5, %v905_v6  ;;  %v915_v58 = vld [vmem:[%s2139_s8 + $0xb8] sm:$0xff] }
  0x4c   :  { %1546 = vmatprep.subr.bf16.mxu0 %v1686_v17  ;;  %v904_v1 = vld [vmem:[%s2139_s8 + $0x60] sm:$0xff]  ;;  %v913_v11 = vld [vmem:[%s2139_s8 + $0xa8] sm:$0xff] }
  0x4d   :  { %v1420_v4 = vcombine.high %v900_v0, %v904_v1  ;;  %v908_v7 = vld [vmem:[%s2139_s8 + $0x80] sm:$0xff]  ;;  %1129 = vmatprep.subr.bf16.mxu1 %v1412_v62  ;;  %v1419_v12 = vcombine.low %v900_v0, %v904_v1  ;;  %v1430_v15 = vcombine.high %v909_v10, %v913_v11  ;;  %v1429_v18 = vcombine.low %v909_v10, %v913_v11  ;;  %v917_v21 = vld [vmem:[%s2139_s8 + $0xc8] sm:$0xff]  ;;  %v922_v0 = vld [vmem:[%s2139_s8 + $0xf0] sm:$0xff] }
  0x4e   :  { %v912_v9 = vld [vmem:[%s2139_s8 + $0xa0] sm:$0xff]  ;;  %v919_v1 = vld [vmem:[%s2139_s8 + $0xd8] sm:$0xff]  ;;  %v1440_v5 = vcombine.high %v918_v63, %v922_v0 }
  0x4f   :  { %1547 = vmatpush3.bf16.msra.mxu0 %v1633_v19  ;;  %v1428_v14 = vcombine.high %v908_v7, %v912_v9  ;;  %v916_v19 = vld [vmem:[%s2139_s8 + $0xc0] sm:$0xff] }
  0x50   :  { %1548 = vmatprep.subr.bf16.mxu0 %v1686_v17  ;;  %v1427_v17 = vcombine.low %v908_v7, %v912_v9  ;;  %v1439_v7 = vcombine.low %v918_v63, %v922_v0 }
  0x53   :  { %1549 = vmatpush3.bf16.msra.mxu0 %v1634_v20  ;;  %v920_v20 = vld [vmem:[%s2139_s8 + $0xe0] sm:$0xff] }
  0x54   :  { %1170 = vmatprep.subr.bf16.mxu0 %v1414_v3 }
  0xf6   :  { %v1463_v22 = vpop.f32.mrb[0].mxu0 }
  0xf7   :  { %v1485_v23 = vpop.f32.mrb[0].mxu1  ;;  %v1464_v25 = vpop.f32.mrb[1].mxu0 }
  0xf8   :  { %v1486_v26 = vpop.f32.mrb[1].mxu1  ;;  %v1465_v27 = vadd.f32 %v1464_v25, %v1463_v22  ;;  %v1466_v29 = vpop.f32.mrb[2].mxu0  ;;  %v1436_v22 = vcombine.high %v916_v19, %v920_v20 }
  0xf9   :  { %v1487_v28 = vadd.f32 %v1486_v26, %v1485_v23  ;;  %v1488_v30 = vpop.f32.mrb[2].mxu1  ;;  %v1467_v31 = vpop.f32.mrb[3].mxu0  ;;  %v921_v23 = vld [vmem:[%s2139_s8 + $0xe8] sm:$0xff]  ;;  %v895_v29 = vld [vmem:[%s2139_s8 + $0x18] sm:$0xff] }
  0xfa   :  { %v1489_v32 = vpop.f32.mrb[3].mxu1  ;;  %v610_v33 = vadd.f32 %v1465_v27, %v1337_v24  ;;  %v1435_v24 = vcombine.low %v916_v19, %v920_v20  ;;  %v1437_v25 = vcombine.low %v917_v21, %v921_v23  ;;  %v1438_v26 = vcombine.high %v917_v21, %v921_v23  ;;  %v894_v27 = vld [vmem:[%s2139_s8 + $0x10] sm:$0xff] }
  0xfb   :  { %v899_v32 = vld [vmem:[%s2139_s8 + $0x38] sm:$0xff] }
  0xfc   :  { %v650_v34 = vadd.f32 %v1487_v28, %v610_v33  ;;  %v898_v28 = vld [vmem:[%s2139_s8 + $0x30] sm:$0xff]  ;;  %v1689_v33 = vmov 0  }
  0xfd   :  { %v1415_v30 = vcombine.low %v894_v27, %v898_v28  ;;  %v1416_v31 = vcombine.high %v894_v27, %v898_v28 }
 0x116   :  { %v1507_v35 = vpop.f32.mrb[4].mxu0 }
 0x117   :  { %v1529_v36 = vpop.f32.mrb[4].mxu1  ;;  %v1508_v37 = vpop.f32.mrb[5].mxu0 }
 0x118   :  { %v1509_v38 = vadd.f32 %v1508_v37, %v1507_v35  ;;  %v1530_v39 = vpop.f32.mrb[5].mxu1  ;;  %v1510_v40 = vpop.f32.mrb[6].mxu0  ;;  %v1418_v35 = vcombine.high %v895_v29, %v899_v32 }
 0x119   :  { %v1531_v41 = vadd.f32 %v1530_v39, %v1529_v36  ;;  %v1532_v42 = vpop.f32.mrb[6].mxu1  ;;  %v1511_v43 = vpop.f32.mrb[7].mxu0  ;;  %v820_v36 = vld [vmem:[%s2132_s1] sm:$0xff] }
 0x11a   :  { %v690_v44 = vadd.f32 %v1509_v38, %v650_v34  ;;  %v1533_v45 = vpop.f32.mrb[7].mxu1  ;;  %v1417_v34 = vcombine.low %v895_v29, %v899_v32  ;;  %v1408_v40 = vld [vmem:[%s2138_s7] ss:$0 sm:$0xff] }
 0x11c   :  { %v730_v46 = vadd.f32 %v1531_v41, %v690_v44  ;;  %v902_v44 = vld [vmem:[%s2139_s8 + $0x50] sm:$0xff] }
 0x11e   :  { %v735_v47 = vmax.f32 %v730_v46, 0.0  ;;  %v906_v46 = vld [vmem:[%s2139_s8 + $0x70] sm:$0xff] }
 0x11f   :  { %v1423_v59 = vcombine.low %v902_v44, %v906_v46 }
 0x120   :  { %v736_v48 = vpack.c.bf16 %v735_v47, %v735_v47  ;;  %v903_v47 = vld [vmem:[%s2139_s8 + $0x58] sm:$0xff] }
 0x122   :  { %1551 = vmatmul.mubr.msk.bf16.vlgmr.msra.gmra.mrb[8].mxu0 %vm776_vm1, %v736_v48  ;;  %v907_v48 = vld [vmem:[%s2139_s8 + $0x78] sm:$0xff] }
 0x123   :  { %1171 = vmatpush1.bf16.msra.mxu0 %v1413_v2  ;;  %1202 = vmatprep.mubr.bf16.mxu0 %v1689_v33  ;;  %v1425_v60 = vcombine.low %v903_v47, %v907_v48  ;;  %v923_v2 = vld [vmem:[%s2139_s8 + $0xf8] sm:$0xff] }
 0x124   :  { %1172 = vmatprep.subr.bf16.mxu0 %v1422_v8  ;;  %v1442_v6 = vcombine.high %v919_v1, %v923_v2  ;;  %v1441_v8 = vcombine.low %v919_v1, %v923_v2 }
 0x127   :  { %1173 = vmatpush1.bf16.msra.mxu0 %v1421_v13 }
 0x128   :  { %1174 = vmatprep.subr.bf16.mxu0 %v1430_v15 }
 0x12b   :  { %1175 = vmatpush1.bf16.msra.mxu0 %v1429_v18 }
 0x12c   :  { %1176 = vmatprep.subr.bf16.mxu0 %v1438_v26 }
 0x12f   :  { %1177 = vmatpush1.bf16.msra.mxu0 %v1437_v25 }
 0x130   :  { %1252 = vmatprep.subr.bf16.mxu0 %v1418_v35 }
 0x1f5   :  { %v814_v50 = vpop.f32.mrb[8].mxu0 }
 0x1f6   :  { %v1991_v51 = vadd.f32 %v1402_v49, %v814_v50  ;;  %v1552_v52 = vpop.f32.mrb[9].mxu0 }
 0x1f7   :  { %v817_v53 = vpop.f32.mrb[10].mxu0 }
 0x1f8   :  { %v821_v54 = vmul.f32 0.5, %v1991_v51  ;;  %v830_v55 = vpack.c.bf16 %v1991_v51, %v1991_v51  ;;  %v1553_v56 = vpop.f32.mrb[11].mxu0  ;;  %v1424_v53 = vcombine.high %v902_v44, %v906_v46 }
 0x1f9   :  { %v914_v56 = vld [vmem:[%s2139_s8 + $0xb0] sm:$0xff] }
 0x1fa   :  { %v822_v57 = vmul.f32 1.442695, %v821_v54  ;;  %1557 = vmatmul.mubr.msk.bf16.vlgmr.msra.gmra.mrb[8].mxu1 %vm846_vm2, %v830_v55  ;;  %v1426_v54 = vcombine.high %v903_v47, %v907_v48  ;;  %v910_v55 = vld [vmem:[%s2139_s8 + $0x90] sm:$0xff] }
 0x1fb   :  { %1130 = vmatpush1.bf16.msra.mxu1 %v1411_v61  ;;  %1161 = vmatprep.mubr.bf16.mxu1 %v1689_v33  ;;  %v1432_v61 = vcombine.high %v910_v55, %v914_v56  ;;  %v1431_v3 = vcombine.low %v910_v55, %v914_v56 }
 0x1fc   :  { %1636 = vpow2.f32 %v822_v57  ;;  %1131 = vmatprep.subr.bf16.mxu1 %v1420_v4  ;;  %v911_v57 = vld [vmem:[%s2139_s8 + $0x98] sm:$0xff]  ;;  %s1691_s8 = smov [#allocation4]  }
 0x1fd   :  { %v1434_v62 = vcombine.high %v911_v57, %v915_v58  ;;  %v1433_v4 = vcombine.low %v911_v57, %v915_v58 }
 0x1ff   :  { %1132 = vmatpush1.bf16.msra.mxu1 %v1419_v12 }
 0x200   :  { %1133 = vmatprep.subr.bf16.mxu1 %v1428_v14 }
 0x203   :  { %1134 = vmatpush1.bf16.msra.mxu1 %v1427_v17 }
 0x204   :  { %1135 = vmatprep.subr.bf16.mxu1 %v1436_v22 }
 0x206   :  { %v1637_v16 = vpop.eup %1636 }
 0x207   :  { %825 = vrot.lane.b32.xlu0 %v1637_v16, %s1688_s4  ;;  %1136 = vmatpush1.bf16.msra.mxu1 %v1435_v24 }
 0x208   :  { %1211 = vmatprep.subr.bf16.mxu1 %v1416_v31 }
 0x279   :  { %v826_v37 = vpop.permute.xlu0 %825 }
 0x27a   :  { %v828_v38 = vmul.f32 %v826_v37, %v820_v36 }
 0x27c   :  { %v829_v39 = vadd.f32 %v828_v38, %v1991_v51 }
 0x27e   :  { %1302 = vrot.lane.b32.xlu0 %v829_v39, %s1690_s14  ;;  %s1325_s14 = sshll.u32 %s1691_s8, 4  ;;  %s1326_s14 = int_to_ptr.vmem [resolvable:$true] %s1325_s14 }
 0x27f   :  { %s1638_s15 = scalar_lea.vmem %s1326_s14, 128  ;;  %p1643_p1 = scmp.lt.s32.totalorder %s1326_s14, %s1326_s14 }
 0x280   :  { %p1639_p0 = scmp.ne.s32.totalorder %s1326_s14, %s1638_s15  ;;  %p1644_p2 = scmp.lt.s32.totalorder %s1638_s15, %s1638_s15 }
 0x282   :  { %p1645_p3 = por %p1644_p2, %p1643_p1 }
 0x284   :  { %p1646_p4 = pnand %p1645_p3, %p1639_p0 }
 0x2cd   :  { %v884_v41 = vpop.f32.mrb[8].mxu1 }
 0x2ce   :  { %v885_v42 = vadd.f32 %v1408_v40, %v884_v41  ;;  %v1558_v43 = vpop.f32.mrb[9].mxu1 }
 0x2cf   :  { %v887_v45 = vpop.f32.mrb[10].mxu1 }
 0x2d0   :  { %v890_v49 = vmax.f32 %v885_v42, 0.0  ;;  %v1559_v50 = vpop.f32.mrb[11].mxu1 }
 0x2d2   :  { %v891_v52 = vpack.c.bf16 %v890_v49, %v890_v49 }
 0x2d4   :  { %1443 = vmatmul.mubr.msk.bf16.vlgmr.msra.gmra.mrb[12].mxu1 %vm776_vm1, %v891_v52  ;;  %1444 = vmatmul.mubr.msk.bf16.vlgmr.msra.gmra.mrb[12].mxu0 %vm776_vm1, %v891_v52 }
 0x2d5   :  { %1212 = vmatpush1.bf16.msra.mxu1 %v1415_v30  ;;  %1253 = vmatpush1.bf16.msra.mxu0 %v1417_v34 }
 0x2d6   :  { %1213 = vmatprep.subr.bf16.mxu1 %v1424_v53  ;;  %1254 = vmatprep.subr.bf16.mxu0 %v1426_v54 }
 0x2d7   :  { %1243 = vmatprep.mubr.bf16.mxu1 %v1689_v33  ;;  %1284 = vmatprep.mubr.bf16.mxu0 %v1689_v33 }
 0x2d9   :  { %1214 = vmatpush1.bf16.msra.mxu1 %v1423_v59  ;;  %1255 = vmatpush1.bf16.msra.mxu0 %v1425_v60 }
 0x2da   :  { %1215 = vmatprep.subr.bf16.mxu1 %v1432_v61  ;;  %1256 = vmatprep.subr.bf16.mxu0 %v1434_v62 }
 0x2dd   :  { %1216 = vmatpush1.bf16.msra.mxu1 %v1431_v3  ;;  %1257 = vmatpush1.bf16.msra.mxu0 %v1433_v4 }
 0x2de   :  { %1217 = vmatprep.subr.bf16.mxu1 %v1440_v5  ;;  %1258 = vmatprep.subr.bf16.mxu0 %v1442_v6 }
 0x2e1   :  { %1218 = vmatpush1.bf16.msra.mxu1 %v1439_v7  ;;  %1259 = vmatpush1.bf16.msra.mxu0 %v1441_v8 }
 0x2e4   :  { %1445 = vmatmul.mubr.msk.bf16.vlgmr.msra.gmra.mrb[16].mxu1 %vm776_vm1, %v891_v52  ;;  %1446 = vmatmul.mubr.msk.bf16.vlgmr.msra.gmra.mrb[16].mxu0 %vm776_vm1, %v891_v52 }
 0x2f0   :  { %v1303_v9 = vpop.permute.xlu0 %1302 }
 0x2f1   :  { %v1306_v10 = vsel %vm1305_vm3, %v1991_v51, %v1303_v9 }
 0x2f2   :  { %1308 = vst.msk [vmem:[#allocation4] sm:$0xff] %vm1307_vm4, %v1306_v10 }
 0x2f3   :  { %1649 = shalt.err (!%p1646_p4)
}
 0x2f4   :  { %s1650_s18 = scalar_lea.hbm %s2142_s11, 128 }
 0x2f5   :  { %p1651_p5 = scmp.ne.s32.totalorder %s2142_s11, %s1650_s18  ;;  %p1654_p6 = scmp.lt.u32.totalorder %s1650_s18, %s2142_s11 }
 0x2f7   :  { %p1656_p7 = pnand %p1654_p6, %p1651_p5 }
 0x2f9   :  { %1659 = shalt.err (!%p1656_p7)
}
 0x2fa   :  { %1328 = dma.vmem_to_hbm [thread:$0]  %s1326_s14, 128, %s2142_s11, [#allocation5]   ;;  %v926_v51 = vlaneseq  ;;  %v924_v14 = vld [vmem:[%s2140_s9] sm:$0xff] }
 0x2fb   :  { %s1692_s9 = smov [#allocation2]  }
 0x2fc   :  { %v927_v11 = vshrl.u32 %v926_v51, 7  ;;  %s1315_s11 = sshll.u32 %s1692_s9, 4  ;;  %s1316_s11 = int_to_ptr.vmem [resolvable:$true] %s1315_s11 }
 0x2fd   :  { %s1660_s21 = scalar_lea.vmem %s1316_s11, 1024  ;;  %p1665_p9 = scmp.lt.s32.totalorder %s1316_s11, %s1316_s11 }
 0x2fe   :  { %v928_v12 = vsub.s32 0, %v927_v11  ;;  %v936_v13 = vsub.s32 2, %v927_v11  ;;  %v932_v15 = vsub.s32 1, %v927_v11  ;;  %v940_v16 = vsub.s32 3, %v927_v11  ;;  %p1661_p8 = scmp.ne.s32.totalorder %s1316_s11, %s1660_s21  ;;  %p1666_p10 = scmp.lt.s32.totalorder %s1660_s21, %s1660_s21 }
 0x2ff   :  { %v944_v33 = vsub.s32 4, %v927_v11  ;;  %v952_v34 = vsub.s32 6, %v927_v11  ;;  %v948_v35 = vsub.s32 5, %v927_v11  ;;  %v956_v36 = vsub.s32 7, %v927_v11 }
 0x300   :  { %v929_v17 = vrot.slane %v924_v14, %v928_v12  ;;  %v937_v18 = vrot.slane %v924_v14, %v936_v13  ;;  %v933_v19 = vrot.slane %v924_v14, %v932_v15  ;;  %v941_v20 = vrot.slane %v924_v14, %v940_v16  ;;  %p1667_p11 = por %p1666_p10, %p1665_p9 }
 0x301   :  { %v945_v37 = vrot.slane %v924_v14, %v944_v33  ;;  %v953_v38 = vrot.slane %v924_v14, %v952_v34  ;;  %v949_v39 = vrot.slane %v924_v14, %v948_v35  ;;  %v957_v40 = vrot.slane %v924_v14, %v956_v36 }
 0x302   :  { %p1668_p12 = pnand %p1667_p11, %p1661_p8 }
 0x3a7   :  { %v1163_v21 = vpop.f32.mrb[12].mxu1  ;;  %v1204_v22 = vpop.f32.mrb[12].mxu0 }
 0x3a8   :  { %v1164_v23 = vadd.f32 %v1163_v21, %v929_v17  ;;  %v1205_v24 = vadd.f32 %v1204_v22, %v937_v18  ;;  %v1165_v25 = vpop.f32.mrb[13].mxu1  ;;  %v1206_v26 = vpop.f32.mrb[13].mxu0 }
 0x3a9   :  { %v1166_v27 = vadd.f32 %v1165_v25, %v933_v19  ;;  %v1207_v28 = vadd.f32 %v1206_v26, %v941_v20  ;;  %v1167_v29 = vpop.f32.mrb[14].mxu1  ;;  %v1208_v30 = vpop.f32.mrb[14].mxu0 }
 0x3aa   :  { %1293 = vst [vmem:[#allocation2] sm:$0xff] %v1164_v23  ;;  %1295 = vst [vmem:[#allocation2 + $0x10] sm:$0xff] %v1205_v24  ;;  %v1168_v31 = vpop.f32.mrb[15].mxu1  ;;  %v1209_v32 = vpop.f32.mrb[15].mxu0 }
 0x3ab   :  { %1294 = vst [vmem:[#allocation2 + $0x8] sm:$0xff] %v1166_v27  ;;  %1296 = vst [vmem:[#allocation2 + $0x18] sm:$0xff] %v1207_v28 }
 0x3b7   :  { %v1245_v41 = vpop.f32.mrb[16].mxu1  ;;  %v1286_v42 = vpop.f32.mrb[16].mxu0 }
 0x3b8   :  { %v1246_v43 = vadd.f32 %v1245_v41, %v945_v37  ;;  %v1287_v44 = vadd.f32 %v1286_v42, %v953_v38  ;;  %v1247_v45 = vpop.f32.mrb[17].mxu1  ;;  %v1288_v46 = vpop.f32.mrb[17].mxu0 }
 0x3b9   :  { %v1248_v47 = vadd.f32 %v1247_v45, %v949_v39  ;;  %v1289_v48 = vadd.f32 %v1288_v46, %v957_v40  ;;  %v1249_v49 = vpop.f32.mrb[18].mxu1  ;;  %v1290_v50 = vpop.f32.mrb[18].mxu0 }
 0x3ba   :  { %1297 = vst [vmem:[#allocation2 + $0x20] sm:$0xff] %v1246_v43  ;;  %1299 = vst [vmem:[#allocation2 + $0x30] sm:$0xff] %v1287_v44  ;;  %v1250_v52 = vpop.f32.mrb[19].mxu1  ;;  %v1291_v53 = vpop.f32.mrb[19].mxu0 }
 0x3bb   :  { %1298 = vst [vmem:[#allocation2 + $0x28] sm:$0xff] %v1248_v47  ;;  %1300 = vst [vmem:[#allocation2 + $0x38] sm:$0xff] %v1289_v48 }
 0x3bc   :  { %1671 = shalt.err (!%p1668_p12)
}
 0x3bd   :  { %s1672_s24 = scalar_lea.hbm %s2141_s10, 1024 }
 0x3be   :  { %p1673_p13 = scmp.ne.s32.totalorder %s2141_s10, %s1672_s24  ;;  %p1676_p0 = scmp.lt.u32.totalorder %s1672_s24, %s2141_s10 }
 0x3c0   :  { %p1678_p1 = pnand %p1676_p0, %p1673_p13 }
 0x3c2   :  { %1681 = shalt.err (!%p1678_p1)
}
 0x3c3   :  { %1318 = dma.vmem_to_hbm [thread:$0]  %s1316_s11, 1024, %s2141_s10, [#allocation3]  }
 0x3c4   :  { %1682 = dma.done.wait [#allocation3], 1024  }
 0x3c5   :  { %1683 = vsyncadd [#allocation3], 4294966272 }
 0x3c6   :  { %1684 = dma.done.wait [#allocation5], 128  }
 0x3c7   :  { %1685 = vsyncadd [#allocation5], 4294967168 }
 0x3c8   :  { %1335 = vsyncpa [#allocation3], 1 }
 0x3c9   :  { %1336 = vsyncpa [#allocation5], 1 }

</bundles_post_ra>
